<compile_context>
chip_gen: v6e
topology: v6e:2x2x1
jax: 0.10.0
libtpu: 0.0.40
codegen_flags: <defaults>
</compile_context>

<pallas_src>
import functools

import jax
import jax.numpy as jnp
from jax.experimental import pallas as pl
from jax.experimental.pallas import tpu as pltpu

_LANE = 128
_SUBLANE = 8


def _per_row_loss(x, tgt, at, gamma):
    """Per-row focal loss for one (tile_n, c_pad) f32 block. Returns (tile_n, 1)."""
    tn, c = x.shape
    # Numerically stable log-softmax pieces (3 cross-lane reduces total).
    m = jnp.max(x, axis=-1, keepdims=True)                    # (tn, 1)
    z = x - m
    denom = jnp.sum(jnp.exp(z), axis=-1, keepdims=True)       # (tn, 1)
    log_denom = jnp.log(denom)

    classes = jax.lax.broadcasted_iota(jnp.int32, (tn, c), 1)
    onehot = (classes == tgt).astype(jnp.float32)             # (tn, c)
    zt = jnp.sum(onehot * z, axis=-1, keepdims=True)          # (tn, 1)

    logpt = zt - log_denom                                    # log p_t (unweighted)
    logpt_w = logpt * at                                      # alpha-weighted

    gamma = float(gamma)
    if gamma == 0.0:                                          # focal factor == 1
        return -logpt_w
    pt = jnp.exp(logpt)                                       # per-row only (EUP)
    one_minus = jnp.maximum(1.0 - pt, 0.0)
    if gamma.is_integer() and 1.0 <= gamma <= 4.0:
        w = one_minus
        for _ in range(int(gamma) - 1):
            w = w * one_minus
    else:
        w = one_minus ** gamma
    return -w * logpt_w


def _focal_none_kernel(x_ref, tgt_ref, at_ref, out_ref, *, gamma):
    x = x_ref[...].astype(jnp.float32)
    out_ref[...] = _per_row_loss(x, tgt_ref[...], at_ref[...], gamma)


def _focal_reduce_kernel(x_ref, tgt_ref, at_ref, out_ref, *, gamma, reduction,
                         n_true, tile_n):
    pid = pl.program_id(0)

    @pl.when(pid == 0)
    def _init():
        out_ref[...] = jnp.zeros_like(out_ref)

    x = x_ref[...].astype(jnp.float32)
    loss = _per_row_loss(x, tgt_ref[...], at_ref[...], gamma)  # (tile_n, 1)

    if n_true % tile_n != 0:  # mask padded rows (static check)
        row = pid * tile_n + jax.lax.broadcasted_iota(jnp.int32, loss.shape, 0)
        loss = jnp.where(row < n_true, loss, 0.0)

    out_ref[...] += jnp.sum(loss, axis=0, keepdims=True)       # (1, 1) partial

    @pl.when(pid == pl.num_programs(0) - 1)
    def _finalize():
        if reduction == "mean":
            out_ref[...] = out_ref[...] * (1.0 / n_true)


def focal_loss(x, target, *, gamma=0.0, alpha=None, reduction="mean"):
    """JAX/Pallas equivalent of FocalLoss.forward.

    x:      (N, C) float logits (f32 or bf16)
    target: (N,)   int class indices
    alpha:  optional (C,) float class weights
    """
    n, c = x.shape
    if x.dtype not in (jnp.bfloat16, jnp.float32):
        x = x.astype(jnp.float32)
    itemsize = jnp.dtype(x.dtype).itemsize

    # Pad class dim to a multiple of 128 lanes; padded logits are a large
    # negative finite value (not -inf, so 0 * pad stays 0 in the gather).
    c_pad = ((c + _LANE - 1) // _LANE) * _LANE
    if c_pad > c:
        x = jnp.concatenate([x, jnp.full((n, c_pad - c), -1e30, x.dtype)], axis=1)

    # Row tile: ~4 MiB of logits per tile (double-buffered -> ~8 MiB), which is
    # safe on v5e's 16 MiB scoped default and well inside v7x's 64 MiB VMEM.
    budget = 4 * 1024 * 1024
    tile_n = min(budget // (c_pad * itemsize), 2048)
    tile_n = max(_SUBLANE, (tile_n // _SUBLANE) * _SUBLANE)
    n_up = ((n + _SUBLANE - 1) // _SUBLANE) * _SUBLANE
    tile_n = min(tile_n, n_up)
    n_pad = ((n + tile_n - 1) // tile_n) * tile_n
    grid = (n_pad // tile_n,)

    if n_pad > n:
        x = jnp.concatenate([x, jnp.zeros((n_pad - n, c_pad), x.dtype)], axis=0)

    tgt = target.astype(jnp.int32)
    # alpha[target] is an O(N) gather -- negligible next to the (N, C) stream,
    # and it removes an (N, C) multiply + cross-lane reduce from the kernel.
    if alpha is None:
        at = jnp.ones((n,), jnp.float32)
    else:
        at = jnp.asarray(alpha, jnp.float32)[tgt]
    if n_pad > n:
        tgt = jnp.concatenate([tgt, jnp.zeros((n_pad - n,), jnp.int32)])
        at = jnp.concatenate([at, jnp.zeros((n_pad - n,), jnp.float32)])
    tgt2d = tgt.reshape(n_pad, 1)
    at2d = at.reshape(n_pad, 1)

    in_specs = [
        pl.BlockSpec((tile_n, c_pad), lambda i: (i, 0)),
        pl.BlockSpec((tile_n, 1), lambda i: (i, 0)),
        pl.BlockSpec((tile_n, 1), lambda i: (i, 0)),
    ]

    if reduction == "none":
        out = pl.pallas_call(
            functools.partial(_focal_none_kernel, gamma=float(gamma)),
            out_shape=jax.ShapeDtypeStruct((n_pad, 1), jnp.float32),
            grid=grid,
            in_specs=in_specs,
            out_specs=pl.BlockSpec((tile_n, 1), lambda i: (i, 0)),
            compiler_params=pltpu.CompilerParams(
                dimension_semantics=("parallel",)),
        )(x, tgt2d, at2d)
        # TODO(synk): for small C a lane-dense (1, tile_n) output layout would
        # avoid masked vst.msk stores, at the cost of an in-kernel transpose.
        return out[:n, 0]

    if reduction not in ("mean", "sum"):
        raise ValueError(f"unknown reduction: {reduction}")

    # TODO(synk): on v7x a two-stage reduction (per-core partials + combine)
    # would use both TensorCores; a single resident accumulator keeps it simple.
    out = pl.pallas_call(
        functools.partial(_focal_reduce_kernel, gamma=float(gamma),
                          reduction=reduction, n_true=n, tile_n=tile_n),
        out_shape=jax.ShapeDtypeStruct((1, 1), jnp.float32),
        grid=grid,
        in_specs=in_specs,
        out_specs=pl.BlockSpec((1, 1), lambda i: (0, 0)),
        compiler_params=pltpu.CompilerParams(
            dimension_semantics=("arbitrary",)),
    )(x, tgt2d, at2d)
    return out[0, 0]


def _focal_loss_ref(x, target, *, gamma, alpha, reduction):
    """Pure-JAX reference mirroring the PyTorch forward."""
    logp = jax.nn.log_softmax(x.astype(jnp.float32), axis=-1)
    p = jnp.exp(logp)
    n = x.shape[0]
    pt = p[jnp.arange(n), target]
    logpt = logp[jnp.arange(n), target]
    if alpha is not None:
        logpt = logpt * jnp.asarray(alpha, jnp.float32)[target]
    loss = -1.0 * (1.0 - pt) ** gamma * logpt
    if reduction == "none":
        return loss
    if reduction == "mean":
        return loss.mean()
    return loss.sum()


if __name__ == "__main__":
    key = jax.random.PRNGKey(0)
    kx, kt = jax.random.split(key)

    N, C = 8, 7
    gamma = 2.0
    alpha = [0.5, 1.0, 1.5, 0.75, 1.25, 0.9, 1.1]

    x = jax.random.normal(kx, (N, C), dtype=jnp.float32)
    target = jax.random.randint(kt, (N,), 0, C, dtype=jnp.int32)

    for reduction in ("mean", "sum", "none"):
        out = focal_loss(x, target, gamma=gamma, alpha=alpha, reduction=reduction)
        out = jax.block_until_ready(out)
        ref = _focal_loss_ref(x, target, gamma=gamma, alpha=alpha,
                              reduction=reduction)
        assert jnp.allclose(out, ref, atol=1e-5, rtol=1e-5), (reduction, out, ref)

    # gamma=0 / alpha=None fast path (module defaults)
    out0 = focal_loss(x, target, gamma=0.0, alpha=None, reduction="mean")
    out0 = jax.block_until_ready(out0)
    ref0 = _focal_loss_ref(x, target, gamma=0.0, alpha=None, reduction="mean")
    assert jnp.allclose(out0, ref0, atol=1e-5, rtol=1e-5), (out0, ref0)

    print("KERNEL_OK")
</pallas_src>

<mosaic_0001>
module attributes {stable_mosaic.version = 11 : i64} {
  func.func @_focal_reduce_kernel(%arg0: i32, %arg1: memref<8x128xf32, #tpu.memory_space<vmem>>, %arg2: memref<8x1xi32, #tpu.memory_space<vmem>>, %arg3: memref<8x1xf32, #tpu.memory_space<vmem>>, %arg4: memref<1x1xf32, #tpu.memory_space<vmem>>) attributes {dimension_semantics = [#tpu.dimension_semantics<arbitrary>], iteration_bounds = array<i64: 1>, scalar_prefetch = 0 : i64, scratch_operands = 0 : i64, tpu.core_type = #tpu.core_type<tc>, window_params = [{transform_indices = @transform_0, window_bounds = array<i64: 8, 128>}, {transform_indices = @transform_1, window_bounds = array<i64: 8, 1>}, {transform_indices = @transform_2, window_bounds = array<i64: 8, 1>}, {pipeline_mode = #tpu.pipeline_mode<synchronous>, transform_indices = @transform_3, window_bounds = array<i64: 1, 1>}]} {
    %c0_i32 = arith.constant 0 : i32
    %0 = arith.cmpi eq, %arg0, %c0_i32 : i32
    %1 = arith.extui %0 : i1 to i32
    %c0_i32_0 = arith.constant 0 : i32
    %2 = arith.cmpi ne, %1, %c0_i32_0 : i32
    scf.if %2 {
      %cst_18 = arith.constant 0.000000e+00 : f32
      %41 = vector.broadcast %cst_18 : f32 to vector<1x1xf32>
      %c0_19 = arith.constant 0 : index
      %c0_20 = arith.constant 0 : index
      %42 = vector.load %arg4[%c0_19, %c0_20] : memref<1x1xf32, #tpu.memory_space<vmem>>, vector<1x1xf32>
      tpu.vector_store %arg4[%c0_19, %c0_20], %41 {strides = array<i32>} : memref<1x1xf32, #tpu.memory_space<vmem>>, vector<1x1xf32>,
    } else {
    }
    %c0 = arith.constant 0 : index
    %c0_1 = arith.constant 0 : index
    %3 = vector.load %arg1[%c0, %c0_1] : memref<8x128xf32, #tpu.memory_space<vmem>>, vector<8x128xf32>
    %c0_2 = arith.constant 0 : index
    %c0_3 = arith.constant 0 : index
    %4 = vector.load %arg2[%c0_2, %c0_3] : memref<8x1xi32, #tpu.memory_space<vmem>>, vector<8x1xi32>
    %c0_4 = arith.constant 0 : index
    %c0_5 = arith.constant 0 : index
    %5 = vector.load %arg3[%c0_4, %c0_5] : memref<8x1xf32, #tpu.memory_space<vmem>>, vector<8x1xf32>
    %cst = arith.constant dense<0xFF800000> : vector<8xf32>
    %6 = vector.multi_reduction <maximumf>, %3, %cst [1] : vector<8x128xf32> to vector<8xf32>
    %7 = vector.shape_cast %6 : vector<8xf32> to vector<8x1xf32>
    %8 = vector.broadcast %7 : vector<8x1xf32> to vector<8x128xf32>
    %9 = arith.subf %3, %8 : vector<8x128xf32>
    %10 = math.exp %9 : vector<8x128xf32>
    %cst_6 = arith.constant dense<0.000000e+00> : vector<8xf32>
    %11 = vector.multi_reduction <add>, %10, %cst_6 [1] : vector<8x128xf32> to vector<8xf32>
    %12 = vector.shape_cast %11 : vector<8xf32> to vector<8x1xf32>
    %13 = math.log %12 : vector<8x1xf32>
    %14 = tpu.iota {dimensions = array<i32: 1>} : vector<8x128xi32>
    %15 = vector.broadcast %4 : vector<8x1xi32> to vector<8x128xi32>
    %16 = arith.cmpi eq, %14, %15 : vector<8x128xi32>
    %17 = arith.extui %16 : vector<8x128xi1> to vector<8x128xi32>
    %18 = arith.sitofp %17 : vector<8x128xi32> to vector<8x128xf32>
    %19 = arith.mulf %18, %9 : vector<8x128xf32>
    %cst_7 = arith.constant dense<0.000000e+00> : vector<8xf32>
    %20 = vector.multi_reduction <add>, %19, %cst_7 [1] : vector<8x128xf32> to vector<8xf32>
    %21 = vector.shape_cast %20 : vector<8xf32> to vector<8x1xf32>
    %22 = arith.subf %21, %13 : vector<8x1xf32>
    %23 = arith.mulf %22, %5 : vector<8x1xf32>
    %24 = math.exp %22 : vector<8x1xf32>
    %cst_8 = arith.constant 1.000000e+00 : f32
    %25 = vector.broadcast %cst_8 : f32 to vector<8x1xf32>
    %26 = arith.subf %25, %24 : vector<8x1xf32>
    %cst_9 = arith.constant 0.000000e+00 : f32
    %27 = vector.broadcast %cst_9 : f32 to vector<8x1xf32>
    %28 = arith.maximumf %26, %27 : vector<8x1xf32>
    %29 = arith.mulf %28, %28 : vector<8x1xf32>
    %cst_10 = arith.constant 0.000000e+00 : f32
    %30 = vector.broadcast %cst_10 : f32 to vector<8x1xf32>
    %31 = arith.subf %30, %29 : vector<8x1xf32>
    %32 = arith.mulf %31, %23 : vector<8x1xf32>
    %c0_11 = arith.constant 0 : index
    %c0_12 = arith.constant 0 : index
    %33 = vector.load %arg4[%c0_11, %c0_12] : memref<1x1xf32, #tpu.memory_space<vmem>>, vector<1x1xf32>
    %cst_13 = arith.constant dense<0.000000e+00> : vector<1xf32>
    %34 = vector.multi_reduction <add>, %32, %cst_13 [0] : vector<8x1xf32> to vector<1xf32>
    %35 = vector.shape_cast %34 : vector<1xf32> to vector<1x1xf32>
    %36 = arith.addf %33, %35 : vector<1x1xf32>
    %c0_14 = arith.constant 0 : index
    %c0_15 = arith.constant 0 : index
    %37 = vector.load %arg4[%c0_14, %c0_15] : memref<1x1xf32, #tpu.memory_space<vmem>>, vector<1x1xf32>
    tpu.vector_store %arg4[%c0_14, %c0_15], %36 {strides = array<i32>} : memref<1x1xf32, #tpu.memory_space<vmem>>, vector<1x1xf32>,
    %c0_i32_16 = arith.constant 0 : i32
    %38 = arith.cmpi eq, %arg0, %c0_i32_16 : i32
    %39 = arith.extui %38 : i1 to i32
    %c0_i32_17 = arith.constant 0 : i32
    %40 = arith.cmpi ne, %39, %c0_i32_17 : i32
    scf.if %40 {
      %c0_18 = arith.constant 0 : index
      %c0_19 = arith.constant 0 : index
      %41 = vector.load %arg4[%c0_18, %c0_19] : memref<1x1xf32, #tpu.memory_space<vmem>>, vector<1x1xf32>
      %cst_20 = arith.constant 1.250000e-01 : f32
      %42 = vector.broadcast %cst_20 : f32 to vector<1x1xf32>
      %43 = arith.mulf %41, %42 : vector<1x1xf32>
      %c0_21 = arith.constant 0 : index
      %c0_22 = arith.constant 0 : index
      %44 = vector.load %arg4[%c0_21, %c0_22] : memref<1x1xf32, #tpu.memory_space<vmem>>, vector<1x1xf32>
      tpu.vector_store %arg4[%c0_21, %c0_22], %43 {strides = array<i32>} : memref<1x1xf32, #tpu.memory_space<vmem>>, vector<1x1xf32>,
    } else {
    }
    return
  }
  func.func @transform_0(%arg0: i32) -> (i32, i32) {
    %c0_i32 = arith.constant 0 : i32
    %c0_i32_0 = arith.constant 0 : i32
    return %arg0, %c0_i32 : i32, i32
  }
  func.func @transform_1(%arg0: i32) -> (i32, i32) {
    %c0_i32 = arith.constant 0 : i32
    %c0_i32_0 = arith.constant 0 : i32
    return %arg0, %c0_i32 : i32, i32
  }
  func.func @transform_2(%arg0: i32) -> (i32, i32) {
    %c0_i32 = arith.constant 0 : i32
    %c0_i32_0 = arith.constant 0 : i32
    return %arg0, %c0_i32 : i32, i32
  }
  func.func @transform_3(%arg0: i32) -> (i32, i32) {
    %c0_i32 = arith.constant 0 : i32
    %c0_i32_0 = arith.constant 0 : i32
    %c0_i32_1 = arith.constant 0 : i32
    return %c0_i32, %c0_i32_0 : i32, i32
  }
}

</mosaic_0001>

<bundles_post_ra>
// kernel: tpu_custom_call.1
= control target key start
LH: loop header
LB: loop body
LE: loop exit
PB: predicated region body
PF: predicated region fallthrough
CT: control target
= control target key end

     0   :  { %s156_s0 = inlined_call_operand.vmem [shape: f32[8,128], index: 0, kind: input, shape index: {}]   ;;  %s157_s1 = inlined_call_operand.vmem [shape: s32[8,1], index: 1, kind: input, shape index: {}]   ;;  %s158_s2 = inlined_call_operand.vmem [shape: f32[8,1], index: 2, kind: input, shape index: {}]   ;;  %s159_s3 = inlined_call_operand.hbm [shape: f32[1,1], index: 3, kind: output, shape index: {}]  }
   0x1   :  { %v21_v0 = vld [vmem:[%s156_s0] sm:$0xff] }
   0x2   :  { %8 = vsyncpa [#allocation3], 0  ;;  %24 = vmax.xlane.f32.xlu0 %v21_v0  ;;  %v118_v1 = vmov 0   ;;  %vm19_vm0 = vcmask 0   ;;  %v119_v2 = vmov 0.0   ;;  %v22_v3 = vld [vmem:[%s157_s1] sm:$0xff]  ;;  %v33_v7 = vlaneseq }
   0x3   :  { %89 = vset.pattern.permute.xlu0 %v118_v1  ;;  %20 = vst.msk [vmem:[#allocation2] sm:$0x1] %vm19_vm0, %v119_v2  ;;  %v23_v22 = vld [vmem:[%s158_s2] sm:$0xff]  ;;  %vm54_vm2 = vcmask 7168   ;;  %s120_s16 = smov [#allocation2]  }
   0x4   :  { %v34_v8 = vand.u32 127, %v33_v7  ;;  %s77_s17 = sshll.u32 %s120_s16, 4  ;;  %s78_s17 = int_to_ptr.vmem [resolvable:$true] %s77_s17 }
   0x5   :  { %s96_s2 = scalar_lea.vmem %s78_s17, 16  ;;  %s100_s18 = scalar_lea.vmem %s78_s17, 32 }
   0x6   :  { %p97_p0 = scmp.ne.s32.totalorder %s78_s17, %s96_s2  ;;  %p101_p1 = scmp.lt.s32.totalorder %s78_s17, %s78_s17 }
   0x7   :  { %p102_p2 = scmp.lt.s32.totalorder %s100_s18, %s96_s2 }
   0x9   :  { %p103_p3 = por %p102_p2, %p101_p1 }
   0xa   :  { %v53_v33 = vld [vmem:[#allocation2] sm:$0x1] }
   0xb   :  { %p104_p4 = pnand %p103_p3, %p97_p0 }
  0x18   :  { %36 = vperm.xlu0 %89, %v22_v3  }
  0x8b   :  { %v25_v4 = vpop.xlane.xlu0 %24 }
  0x8c   :  { %v26_v5 = vsub.f32 %v21_v0, %v25_v4 }
  0x8e   :  { %v27_v6 = vmul.f32 1.442695, %v26_v5 }
  0x90   :  { %90 = vpow2.f32 %v27_v6 }
  0x93   :  { %v37_v9 = vpop.permute.xlu0 %36 }
  0x94   :  { %vm38_vm1 = vcmp.eq.s32.totalorder %v34_v8, %v37_v9 }
  0x95   :  { %v85_v11 = vsel %vm38_vm1, 1.0, %v119_v2 }
  0x96   :  { %v41_v12 = vmul.f32 %v85_v11, %v26_v5 }
  0x9d   :  { %v91_v10 = vpop.eup %90 }
  0x9e   :  { %29 = vadd.xlane.f32.xlu1 %v91_v10 }
  0xa2   :  { %42 = vadd.xlane.f32.xlu1 %v41_v12 }
 0x127   :  { %v30_v13 = vpop.xlane.xlu1 %29 }
 0x128   :  { %92 = vlog2.f32 %v30_v13 }
 0x12b   :  { %v43_v16 = vpop.xlane.xlu1 %42 }
 0x135   :  { %v93_v14 = vpop.eup %92 }
 0x136   :  { %v32_v15 = vmul.f32 0.6931472, %v93_v14 }
 0x138   :  { %v44_v17 = vsub.f32 %v43_v16, %v32_v15 }
 0x13a   :  { %v46_v18 = vmul.f32 1.442695, %v44_v17  ;;  %v45_v24 = vmul.f32 %v44_v17, %v23_v22 }
 0x13c   :  { %94 = vpow2.f32 %v46_v18 }
 0x149   :  { %v95_v19 = vpop.eup %94 }
 0x14a   :  { %v48_v20 = vsub.f32 1.0, %v95_v19 }
 0x14c   :  { %v49_v21 = vmax.f32 %v48_v20, 0.0 }
 0x14e   :  { %v50_v23 = vmul.f32 %v49_v21, %v49_v21 }
 0x150   :  { %v51_v25 = vsub.f32 0.0, %v50_v23 }
 0x152   :  { %v52_v26 = vmul.f32 %v51_v25, %v45_v24 }
 0x154   :  { %v55_v27 = vsel %vm54_vm2, %v52_v26, 0.0 }
 0x155   :  { %v56_v28 = vrot.slane %v55_v27, 4 }
 0x157   :  { %v57_v29 = vadd.f32 %v56_v28, %v55_v27 }
 0x159   :  { %v58_v30 = vrot.slane %v57_v29, 2 }
 0x15b   :  { %v59_v31 = vadd.f32 %v58_v30, %v57_v29 }
 0x15d   :  { %v60_v32 = vrot.slane %v59_v31, 1 }
 0x15f   :  { %v61_v34 = vadd.f32 %v60_v32, %v59_v31 }
 0x161   :  { %v62_v35 = vadd.f32 %v61_v34, %v53_v33 }
 0x163   :  { %64 = vst.msk [vmem:[#allocation2] sm:$0x1] %vm19_vm0, %v62_v35 }
 0x16a   :  { %v68_v36 = vld [vmem:[#allocation2] sm:$0x1] }
 0x16b   :  { %v69_v37 = vmul.f32 0.125, %v68_v36 }
 0x16d   :  { %70 = vst.msk [vmem:[#allocation2] sm:$0x1] %vm19_vm0, %v69_v37 }
 0x16e   :  { %107 = shalt.err (!%p104_p4)
}
 0x16f   :  { %80 = dma.vmem_to_hbm [thread:$0]  %s78_s17, 16, %s159_s3, [#allocation3]  }
 0x170   :  { %116 = dma.done.wait [#allocation3], 16  }
 0x171   :  { %117 = vsyncadd [#allocation3], 4294967280 }
 0x172   :  { %84 = vsyncpa [#allocation3], 1 }

</bundles_post_ra>
